<compile_context>
chip_gen: v5e
topology: v5e:2x2
jax: 0.10.0
libtpu: 0.0.40
codegen_flags: <defaults>
</compile_context>

<pallas_src>
import jax
import jax.numpy as jnp
from jax.experimental import pallas as pl
from jax.experimental.pallas import tpu as pltpu


N_STATION_FEATURES = 3
N_TIME_FEATURES = 5


# ---------------------------------------------------------------------------
# Kernels: out = relu(x_grid @ W1g [+ x_extra @ W1e] + b1) @ W2 + b2
# f32 accumulation on the MXU; bias/ReLU in f32 (v5e has no bf16 VPU).
# Inputs are cast to the weight dtype *inside* the kernel (no wrapper cast).
# ---------------------------------------------------------------------------
def _mlp_kernel_with_extras(xg_ref, xe_ref, w1g_ref, w1e_ref, b1_ref,
                            w2_ref, b2_ref, o_ref):
    cdt = w1g_ref.dtype
    h = jnp.dot(xg_ref[...].astype(cdt), w1g_ref[...],
                preferred_element_type=jnp.float32)
    h = h + jnp.dot(xe_ref[...].astype(cdt), w1e_ref[...],
                    preferred_element_type=jnp.float32)
    h = h + b1_ref[...]                       # b1 is f32
    h = jnp.maximum(h, 0.0)
    y = jnp.dot(h.astype(w2_ref.dtype), w2_ref[...],
                preferred_element_type=jnp.float32)
    y = y + b2_ref[...]                       # b2 is f32
    o_ref[...] = y.astype(o_ref.dtype)


def _mlp_kernel_grid_only(xg_ref, w1g_ref, b1_ref, w2_ref, b2_ref, o_ref):
    cdt = w1g_ref.dtype
    h = jnp.dot(xg_ref[...].astype(cdt), w1g_ref[...],
                preferred_element_type=jnp.float32)
    h = h + b1_ref[...]
    h = jnp.maximum(h, 0.0)
    y = jnp.dot(h.astype(w2_ref.dtype), w2_ref[...],
                preferred_element_type=jnp.float32)
    y = y + b2_ref[...]
    o_ref[...] = y.astype(o_ref.dtype)


# ---------------------------------------------------------------------------
# Parameter prep: split W1 rows (grid | extras), zero-pad hidden dim to 128.
# Biases are kept in f32 regardless of the weight dtype (tiny, free).
# ---------------------------------------------------------------------------
def prepare_params(params, d_grid, use_sti=True, use_time=True,
                   dtype=jnp.float32):
    w1, b1, w2, b2 = params
    d_in, n_fc1 = w1.shape
    n_extra = ((N_TIME_FEATURES if use_time else 0) +
               (N_STATION_FEATURES if use_sti else 0))
    assert d_in == d_grid + n_extra

    n_h = max(128, ((n_fc1 + 127) // 128) * 128)   # lane-dense hidden dim
    pad_h = n_h - n_fc1
    w1p = jnp.pad(w1, ((0, 0), (0, pad_h)))
    b1p = jnp.pad(b1.reshape(1, -1), ((0, 0), (0, pad_h)))
    w2p = jnp.pad(w2, ((0, pad_h), (0, 0)))        # zero rows -> no leakage

    return {
        "w1_grid": w1p[:d_grid].astype(dtype),
        "w1_extra": (w1p[d_grid:].astype(dtype) if n_extra > 0 else None),
        "b1": b1p.astype(jnp.float32),
        "w2": w2p.astype(dtype),
        "b2": b2.reshape(1, -1).astype(jnp.float32),
    }


# ---------------------------------------------------------------------------
# Tiling / VMEM helpers
# ---------------------------------------------------------------------------
def _sublane_align(itemsize):
    # f32 -> 8 sublanes, bf16 -> 16, 8-bit -> 32 (sub-32-bit dtypes pack rows)
    return max(8, (4 // max(1, itemsize)) * 8)


def _scoped_vmem_limit():
    """Generation-aware scoped-VMEM request: ~96 MiB on 128-MiB parts
    (v5e/v6e), 32 MiB on 64-MiB-per-TC parts (v7x)."""
    mib = 1024 * 1024
    try:
        cap = getattr(pltpu.get_tpu_info(), "vmem_capacity_bytes", None)
    except Exception:
        cap = None
    if cap is None or cap <= 0:
        cap = 64 * mib                          # conservative (v7x per-TC)
    return 96 * mib if cap >= 128 * mib else min(32 * mib, cap)


def _pick_tb(B, block_b, align):
    """Batch-tile size: as large as block_b allows, sublane-aligned, with an
    (even) >= 2-step grid whenever possible so v7x's two TCs both get work."""
    def rup(v):
        return ((v + align - 1) // align) * align

    if B <= max(block_b, align):
        if B >= 2 * align:
            tb = rup(-(-B // 2))                # split roughly in half
            if tb < B:
                return tb
        return B                                # tiny batch: one full block
    tb = rup(min(block_b, B))
    steps = -(-B // tb)
    if steps > 2 and steps % 2 == 1:            # nudge to an even step count
        cand = rup(-(-B // (steps + 1)))
        if cand >= align:
            tb = cand
    return tb


def _fit_tb_to_vmem(tb, align, d_grid, n_extra, n_h, n_pred,
                    x_itemsize, w_itemsize, vmem_limit):
    """Shrink the batch tile if the (double-buffered) working set would not
    fit the scoped-VMEM budget.  Never triggers for small d_grid."""
    def rup(v):
        return ((v + align - 1) // align) * align

    fixed = 2 * ((d_grid + n_extra) * n_h * w_itemsize   # W1 blocks
                 + n_h * n_pred * w_itemsize              # W2
                 + (n_h + n_pred) * 4)                    # f32 biases
    budget = int(vmem_limit * 0.8)
    while tb > align:
        streaming = 2 * tb * ((d_grid + n_extra) * x_itemsize + n_pred * 4)
        live = tb * n_h * 4                               # f32 hidden act
        if fixed + streaming + live <= budget:
            break
        tb = max(align, rup(tb // 2))
        if tb <= align:
            break
    return tb


# ---------------------------------------------------------------------------
# Forward pass (matches FullyConnected1L.forward)
# ---------------------------------------------------------------------------
def fc1l_forward(x, time_features, station_features, prepared,
                 use_sti=True, use_time=True, block_b=4096):
    B = x.shape[0]
    x_grid = x.reshape(B, -1)                  # torch .view(-1, flat_features)

    w1_grid = prepared["w1_grid"]
    b1 = prepared["b1"]
    w2 = prepared["w2"]
    b2 = prepared["b2"]
    d_grid, n_h = w1_grid.shape
    n_pred = w2.shape[1]

    # Assemble the tiny extras block host-side (torch order: x, time, station).
    extras = []
    if use_time:
        extras.append(time_features)
    if use_sti:
        extras.append(station_features)
    x_extra = None
    n_extra = 0
    if extras:
        x_extra = extras[0] if len(extras) == 1 else jnp.concatenate(extras, 1)
        n_extra = x_extra.shape[1]

    x_itemsize = x_grid.dtype.itemsize
    w_itemsize = w2.dtype.itemsize
    align = _sublane_align(x_itemsize)
    vmem_limit = _scoped_vmem_limit()

    tb = _pick_tb(B, block_b, align)
    tb = _fit_tb_to_vmem(tb, align, d_grid, n_extra, n_h, n_pred,
                         x_itemsize, w_itemsize, vmem_limit)
    grid = (pl.cdiv(B, tb),)

    # Advisory cost estimate for XLA scheduling around the custom call.
    flops = 2 * B * ((d_grid + n_extra) * n_h + n_h * n_pred)
    bytes_accessed = (B * d_grid * x_itemsize
                      + (d_grid + n_extra) * n_h * w_itemsize
                      + n_h * 4 + n_h * n_pred * w_itemsize + n_pred * 4
                      + B * n_pred * 4)
    if x_extra is not None:
        bytes_accessed += B * n_extra * x_extra.dtype.itemsize
    cost = pl.CostEstimate(flops=int(flops), transcendentals=0,
                           bytes_accessed=int(bytes_accessed))

    compiler_params = pltpu.CompilerParams(
        dimension_semantics=("parallel",),     # shard batch steps across TCs
        vmem_limit_bytes=int(vmem_limit),
    )

    if x_extra is not None:
        w1_extra = prepared["w1_extra"]
        out = pl.pallas_call(
            _mlp_kernel_with_extras,
            out_shape=jax.ShapeDtypeStruct((B, n_pred), jnp.float32),
            grid=grid,
            in_specs=[
                pl.BlockSpec((tb, d_grid), lambda i: (i, 0)),
                pl.BlockSpec((tb, n_extra), lambda i: (i, 0)),
                pl.BlockSpec((d_grid, n_h), lambda i: (0, 0)),
                pl.BlockSpec((n_extra, n_h), lambda i: (0, 0)),
                pl.BlockSpec((1, n_h), lambda i: (0, 0)),
                pl.BlockSpec((n_h, n_pred), lambda i: (0, 0)),
                pl.BlockSpec((1, n_pred), lambda i: (0, 0)),
            ],
            out_specs=pl.BlockSpec((tb, n_pred), lambda i: (i, 0)),
            compiler_params=compiler_params,
            cost_estimate=cost,
        )(x_grid, x_extra, w1_grid, w1_extra, b1, w2, b2)
    else:
        out = pl.pallas_call(
            _mlp_kernel_grid_only,
            out_shape=jax.ShapeDtypeStruct((B, n_pred), jnp.float32),
            grid=grid,
            in_specs=[
                pl.BlockSpec((tb, d_grid), lambda i: (i, 0)),
                pl.BlockSpec((d_grid, n_h), lambda i: (0, 0)),
                pl.BlockSpec((1, n_h), lambda i: (0, 0)),
                pl.BlockSpec((n_h, n_pred), lambda i: (0, 0)),
                pl.BlockSpec((1, n_pred), lambda i: (0, 0)),
            ],
            out_specs=pl.BlockSpec((tb, n_pred), lambda i: (i, 0)),
            compiler_params=compiler_params,
            cost_estimate=cost,
        )(x_grid, w1_grid, b1, w2, b2)
    return out


def init_params(key, d_in, n_fc1, n_pred):
    """Deterministic init mimicking nn.Linear's U(-1/sqrt(fan_in), ...)."""
    k1, k2, k3, k4 = jax.random.split(key, 4)
    bound1 = 1.0 / jnp.sqrt(jnp.float32(d_in))
    bound2 = 1.0 / jnp.sqrt(jnp.float32(n_fc1))
    # Weights stored transposed: (in, out), kernel does x @ W.
    w1 = jax.random.uniform(k1, (d_in, n_fc1), jnp.float32, -bound1, bound1)
    b1 = jax.random.uniform(k2, (1, n_fc1), jnp.float32, -bound1, bound1)
    w2 = jax.random.uniform(k3, (n_fc1, n_pred), jnp.float32, -bound2, bound2)
    b2 = jax.random.uniform(k4, (1, n_pred), jnp.float32, -bound2, bound2)
    return w1, b1, w2, b2


if __name__ == "__main__":
    # Module hyper-parameters (small, consistent with __init__):
    n_parameters = 4
    n_time_invariant_parameters = 2
    n_grid = 4
    n_fc1 = 32
    prediction_times = (1, 2, 3)          # n_predictions = 3
    use_sti, use_time = True, True        # +3 station feats, +5 time feats

    C = n_parameters + 1 + n_time_invariant_parameters   # 7 channels
    d_grid = C * n_grid * n_grid                          # 112
    d_in = d_grid + (3 if use_sti else 0) + (5 if use_time else 0)  # 120
    n_pred = len(prediction_times)

    key = jax.random.PRNGKey(0)
    (kx, kt, ks, kp, kx2, kt2, ks2, kx3, kt3, ks3) = jax.random.split(key, 10)

    raw_params = init_params(kp, d_in, n_fc1, n_pred)
    w1, b1, w2, b2 = raw_params

    def ref_fn(xg, tf, sf):
        xc = jnp.concatenate([xg, tf, sf], axis=1)
        return jnp.maximum(xc @ w1 + b1, 0.0) @ w2 + b2

    params_f32 = prepare_params(raw_params, d_grid, use_sti, use_time,
                                dtype=jnp.float32)

    # -------------------- (1) tiny demo batch, f32 path --------------------
    B = 2
    x = jax.random.normal(kx, (B, C, n_grid, n_grid), jnp.float32)
    time_features = jax.random.normal(kt, (B, 5), jnp.float32)
    station_features = jax.random.normal(ks, (B, 3), jnp.float32)

    out = fc1l_forward(x, time_features, station_features, params_f32,
                       use_sti=use_sti, use_time=use_time)
    out = jax.block_until_ready(out)
    ref = ref_fn(x.reshape(B, -1), time_features, station_features)
    assert out.shape == (B, n_pred)
    assert jnp.allclose(out, ref, atol=1e-5, rtol=1e-5)

    # --------- (2) larger batch exercising the tiled (2-step) grid ---------
    B2 = 1024
    x2 = jax.random.normal(kx2, (B2, C, n_grid, n_grid), jnp.float32)
    tf2 = jax.random.normal(kt2, (B2, 5), jnp.float32)
    sf2 = jax.random.normal(ks2, (B2, 3), jnp.float32)

    out2 = fc1l_forward(x2, tf2, sf2, params_f32,
                        use_sti=use_sti, use_time=use_time)
    out2 = jax.block_until_ready(out2)
    ref2 = ref_fn(x2.reshape(B2, -1), tf2, sf2)
    assert out2.shape == (B2, n_pred)
    assert jnp.allclose(out2, ref2, atol=1e-4, rtol=1e-4)

    # ----------------- (3) ragged batch (B % tile != 0) --------------------
    B3 = 1000
    x3 = jax.random.normal(kx3, (B3, C, n_grid, n_grid), jnp.float32)
    tf3 = jax.random.normal(kt3, (B3, 5), jnp.float32)
    sf3 = jax.random.normal(ks3, (B3, 3), jnp.float32)

    out3 = fc1l_forward(x3, tf3, sf3, params_f32,
                        use_sti=use_sti, use_time=use_time)
    out3 = jax.block_until_ready(out3)
    ref3 = ref_fn(x3.reshape(B3, -1), tf3, sf3)
    assert out3.shape == (B3, n_pred)
    assert jnp.allclose(out3, ref3, atol=1e-4, rtol=1e-4)

    # ---- (4) bf16 weights + bf16 x (as if produced bf16 upstream);
    #          f32 MXU accumulation and f32 biases ----
    params_bf16 = prepare_params(raw_params, d_grid, use_sti, use_time,
                                 dtype=jnp.bfloat16)
    x2_bf = x2.astype(jnp.bfloat16)            # one-time; models a bf16 producer
    out4 = fc1l_forward(x2_bf, tf2, sf2, params_bf16,
                        use_sti=use_sti, use_time=use_time)
    out4 = jax.block_until_ready(out4)
    # bf16 mirror reference (same split-matmul structure, f32 acc, f32 biases).
    xg_b = x2_bf.reshape(B2, -1)
    xe_b = jnp.concatenate([tf2, sf2], axis=1).astype(jnp.bfloat16)
    h_b = (jnp.dot(xg_b, params_bf16["w1_grid"],
                   preferred_element_type=jnp.float32)
           + jnp.dot(xe_b, params_bf16["w1_extra"],
                     preferred_element_type=jnp.float32)
           + params_bf16["b1"])
    h_b = jnp.maximum(h_b, 0.0).astype(jnp.bfloat16)
    ref4 = (jnp.dot(h_b, params_bf16["w2"],
                    preferred_element_type=jnp.float32)
            + params_bf16["b2"])
    assert out4.shape == (B2, n_pred)
    assert jnp.allclose(out4, ref4, atol=1e-2, rtol=1e-2)

    print("KERNEL_OK")
</pallas_src>

<mosaic_0001>
module attributes {stable_mosaic.version = 11 : i64} {
  func.func @_mlp_kernel_with_extras(%arg0: i32, %arg1: memref<2x112xf32, #tpu.memory_space<vmem>>, %arg2: memref<2x8xf32, #tpu.memory_space<vmem>>, %arg3: memref<112x128xf32, #tpu.memory_space<vmem>>, %arg4: memref<8x128xf32, #tpu.memory_space<vmem>>, %arg5: memref<1x128xf32, #tpu.memory_space<vmem>>, %arg6: memref<128x3xf32, #tpu.memory_space<vmem>>, %arg7: memref<1x3xf32, #tpu.memory_space<vmem>>, %arg8: memref<2x3xf32, #tpu.memory_space<vmem>>) attributes {dimension_semantics = [#tpu.dimension_semantics<parallel>], iteration_bounds = array<i64: 1>, scalar_prefetch = 0 : i64, scratch_operands = 0 : i64, tpu.core_type = #tpu.core_type<tc>, window_params = [{transform_indices = @transform_0, window_bounds = array<i64: 2, 112>}, {transform_indices = @transform_1, window_bounds = array<i64: 2, 8>}, {pipeline_mode = #tpu.pipeline_mode<synchronous>, transform_indices = @transform_2, window_bounds = array<i64: 112, 128>}, {pipeline_mode = #tpu.pipeline_mode<synchronous>, transform_indices = @transform_3, window_bounds = array<i64: 8, 128>}, {pipeline_mode = #tpu.pipeline_mode<synchronous>, transform_indices = @transform_4, window_bounds = array<i64: 1, 128>}, {pipeline_mode = #tpu.pipeline_mode<synchronous>, transform_indices = @transform_5, window_bounds = array<i64: 128, 3>}, {pipeline_mode = #tpu.pipeline_mode<synchronous>, transform_indices = @transform_6, window_bounds = array<i64: 1, 3>}, {transform_indices = @transform_7, window_bounds = array<i64: 2, 3>}]} {
    %c0 = arith.constant 0 : index
    %c0_0 = arith.constant 0 : index
    %0 = vector.load %arg1[%c0, %c0_0] : memref<2x112xf32, #tpu.memory_space<vmem>>, vector<2x112xf32>
    %c0_1 = arith.constant 0 : index
    %c0_2 = arith.constant 0 : index
    %1 = vector.load %arg3[%c0_1, %c0_2] : memref<112x128xf32, #tpu.memory_space<vmem>>, vector<112x128xf32>
    %cst = arith.constant dense<0.000000e+00> : vector<2x128xf32>
    %2 = tpu.matmul %0, %1, %cst {dimension_numbers = #tpu.dot_dimension_numbers<[1], [0], [0], [1], [0, 0, 1, 1], [], []>} : vector<2x112xf32>, vector<112x128xf32>, vector<2x128xf32> -> vector<2x128xf32>
    %c0_3 = arith.constant 0 : index
    %c0_4 = arith.constant 0 : index
    %3 = vector.load %arg2[%c0_3, %c0_4] : memref<2x8xf32, #tpu.memory_space<vmem>>, vector<2x8xf32>
    %c0_5 = arith.constant 0 : index
    %c0_6 = arith.constant 0 : index
    %4 = vector.load %arg4[%c0_5, %c0_6] : memref<8x128xf32, #tpu.memory_space<vmem>>, vector<8x128xf32>
    %cst_7 = arith.constant dense<0.000000e+00> : vector<2x128xf32>
    %5 = tpu.matmul %3, %4, %cst_7 {dimension_numbers = #tpu.dot_dimension_numbers<[1], [0], [0], [1], [0, 0, 1, 1], [], []>} : vector<2x8xf32>, vector<8x128xf32>, vector<2x128xf32> -> vector<2x128xf32>
    %6 = arith.addf %2, %5 : vector<2x128xf32>
    %c0_8 = arith.constant 0 : index
    %c0_9 = arith.constant 0 : index
    %7 = vector.load %arg5[%c0_8, %c0_9] : memref<1x128xf32, #tpu.memory_space<vmem>>, vector<1x128xf32>
    %8 = vector.broadcast %7 : vector<1x128xf32> to vector<2x128xf32>
    %9 = arith.addf %6, %8 : vector<2x128xf32>
    %cst_10 = arith.constant 0.000000e+00 : f32
    %10 = vector.broadcast %cst_10 : f32 to vector<2x128xf32>
    %11 = arith.maximumf %9, %10 : vector<2x128xf32>
    %c0_11 = arith.constant 0 : index
    %c0_12 = arith.constant 0 : index
    %12 = vector.load %arg6[%c0_11, %c0_12] : memref<128x3xf32, #tpu.memory_space<vmem>>, vector<128x3xf32>
    %cst_13 = arith.constant dense<0.000000e+00> : vector<2x3xf32>
    %13 = tpu.matmul %11, %12, %cst_13 {dimension_numbers = #tpu.dot_dimension_numbers<[1], [0], [0], [1], [0, 0, 1, 1], [], []>} : vector<2x128xf32>, vector<128x3xf32>, vector<2x3xf32> -> vector<2x3xf32>
    %c0_14 = arith.constant 0 : index
    %c0_15 = arith.constant 0 : index
    %14 = vector.load %arg7[%c0_14, %c0_15] : memref<1x3xf32, #tpu.memory_space<vmem>>, vector<1x3xf32>
    %15 = vector.broadcast %14 : vector<1x3xf32> to vector<2x3xf32>
    %16 = arith.addf %13, %15 : vector<2x3xf32>
    %c0_16 = arith.constant 0 : index
    %c0_17 = arith.constant 0 : index
    %17 = vector.load %arg8[%c0_16, %c0_17] : memref<2x3xf32, #tpu.memory_space<vmem>>, vector<2x3xf32>
    tpu.vector_store %arg8[%c0_16, %c0_17], %16 {strides = array<i32>} : memref<2x3xf32, #tpu.memory_space<vmem>>, vector<2x3xf32>,
    return
  }
  func.func @transform_0(%arg0: i32) -> (i32, i32) {
    %c0_i32 = arith.constant 0 : i32
    %c0_i32_0 = arith.constant 0 : i32
    return %arg0, %c0_i32 : i32, i32
  }
  func.func @transform_1(%arg0: i32) -> (i32, i32) {
    %c0_i32 = arith.constant 0 : i32
    %c0_i32_0 = arith.constant 0 : i32
    return %arg0, %c0_i32 : i32, i32
  }
  func.func @transform_2(%arg0: i32) -> (i32, i32) {
    %c0_i32 = arith.constant 0 : i32
    %c0_i32_0 = arith.constant 0 : i32
    %c0_i32_1 = arith.constant 0 : i32
    return %c0_i32, %c0_i32_0 : i32, i32
  }
  func.func @transform_3(%arg0: i32) -> (i32, i32) {
    %c0_i32 = arith.constant 0 : i32
    %c0_i32_0 = arith.constant 0 : i32
    %c0_i32_1 = arith.constant 0 : i32
    return %c0_i32, %c0_i32_0 : i32, i32
  }
  func.func @transform_4(%arg0: i32) -> (i32, i32) {
    %c0_i32 = arith.constant 0 : i32
    %c0_i32_0 = arith.constant 0 : i32
    %c0_i32_1 = arith.constant 0 : i32
    return %c0_i32, %c0_i32_0 : i32, i32
  }
  func.func @transform_5(%arg0: i32) -> (i32, i32) {
    %c0_i32 = arith.constant 0 : i32
    %c0_i32_0 = arith.constant 0 : i32
    %c0_i32_1 = arith.constant 0 : i32
    return %c0_i32, %c0_i32_0 : i32, i32
  }
  func.func @transform_6(%arg0: i32) -> (i32, i32) {
    %c0_i32 = arith.constant 0 : i32
    %c0_i32_0 = arith.constant 0 : i32
    %c0_i32_1 = arith.constant 0 : i32
    return %c0_i32, %c0_i32_0 : i32, i32
  }
  func.func @transform_7(%arg0: i32) -> (i32, i32) {
    %c0_i32 = arith.constant 0 : i32
    %c0_i32_0 = arith.constant 0 : i32
    return %arg0, %c0_i32 : i32, i32
  }
}

</mosaic_0001>

<bundles_post_ra>
// kernel: tpu_custom_call.1
= control target key start
LH: loop header
LB: loop body
LE: loop exit
PB: predicated region body
PF: predicated region fallthrough
CT: control target
= control target key end

     0   :  { %vm44_vm0 = vcmask 64512   ;;  %s336_s0 = inlined_call_operand.vmem [shape: f32[2,112], index: 0, kind: input, shape index: {}]   ;;  %s337_s1 = inlined_call_operand.vmem [shape: f32[2,8], index: 1, kind: input, shape index: {}]   ;;  %s338_s2 = inlined_call_operand.vmem [shape: f32[112,128], index: 2, kind: input, shape index: {}]   ;;  %s339_s3 = inlined_call_operand.vmem [shape: f32[8,128], index: 3, kind: input, shape index: {}]   ;;  %s340_s4 = inlined_call_operand.vmem [shape: f32[1,128], index: 4, kind: input, shape index: {}]   ;;  %s341_s5 = inlined_call_operand.vmem [shape: f32[128,3], index: 5, kind: input, shape index: {}]   ;;  %s342_s6 = inlined_call_operand.vmem [shape: f32[1,3], index: 6, kind: input, shape index: {}]   ;;  %s343_s7 = inlined_call_operand.hbm [shape: f32[2,3], index: 7, kind: output, shape index: {}]  }
   0x1   :  { %v41_v0 = vld [vmem:[%s338_s2 + $0x68] sm:$0xff]  ;;  %v40_v1 = vld [vmem:[%s338_s2 + $0x60] sm:$0xff]  ;;  %v39_v2 = vld [vmem:[%s338_s2 + $0x58] sm:$0xff] }
   0x2   :  { %74 = vmatpush.msra.mxu1 %v41_v0  ;;  %v38_v3 = vld [vmem:[%s338_s2 + $0x50] sm:$0xff]  ;;  %v43_v4 = vld [vmem:[%s339_s3] sm:$0xff]  ;;  %v113_v6 = vld [vmem:[%s341_s5 + $0x78] sm:$0xff] }
   0x3   :  { %63 = vmatpush.msra.mxu0 %v43_v4  ;;  %v42_v5 = vld [vmem:[%s337_s1] sm:$0x3]  ;;  %v37_v7 = vld [vmem:[%s338_s2 + $0x48] sm:$0xff]  ;;  %118 = vmatpush.msra.mxu2 %v113_v6  ;;  %v112_v8 = vld [vmem:[%s341_s5 + $0x70] sm:$0xff] }
   0x4   :  { %75 = vmatpush.msra.mxu1 %v40_v1  ;;  %156 = vmatmul.msk.f32.vlgmr.msra.gmra.mxu0 %vm44_vm0, %v42_v5  ;;  %v111_v9 = vld [vmem:[%s341_s5 + $0x68] sm:$0xff]  ;;  %v36_v10 = vld [vmem:[%s338_s2 + $0x40] sm:$0xff]  ;;  %v35_v12 = vld [vmem:[%s338_s2 + $0x38] sm:$0xff] }
   0x5   :  { %119 = vmatpush.msra.mxu2 %v112_v8  ;;  %v110_v11 = vld [vmem:[%s341_s5 + $0x60] sm:$0xff] }
   0x6   :  { %76 = vmatpush.msra.mxu1 %v39_v2 }
   0x7   :  { %120 = vmatpush.msra.mxu2 %v111_v9 }
   0x8   :  { %77 = vmatpush.msra.mxu1 %v38_v3 }
   0xa   :  { %78 = vmatpush.msra.mxu1 %v37_v7 }
   0xb   :  { %12 = vsyncpa [#allocation3], 0  ;;  %v109_v13 = vld [vmem:[%s341_s5 + $0x58] sm:$0xff]  ;;  %v34_v14 = vld [vmem:[%s338_s2 + $0x30] sm:$0xff]  ;;  %121 = vmatpush.msra.mxu2 %v110_v11  ;;  %vm68_vm1 = vcmask 916480   ;;  %s187_s3 = smov [#allocation2]  }
   0xc   :  { %79 = vmatpush.msra.mxu1 %v36_v10  ;;  %v108_v15 = vld [vmem:[%s341_s5 + $0x50] sm:$0xff]  ;;  %v33_v16 = vld [vmem:[%s338_s2 + $0x28] sm:$0xff]  ;;  %v32_v18 = vld [vmem:[%s338_s2 + $0x20] sm:$0xff]  ;;  %s145_s19 = sshll.u32 %s187_s3, 4  ;;  %s147_s20 = sshll.u32 %s343_s7, 4  ;;  %vm138_vm2 = vcmask 17408   ;;  %s146_s19 = int_to_ptr.vmem [resolvable:$true] %s145_s19  ;;  %s148_s20 = int_to_ptr.hbm [resolvable:$true] %s147_s20 }
   0xd   :  { %122 = vmatpush.msra.mxu2 %v109_v13  ;;  %v107_v17 = vld [vmem:[%s341_s5 + $0x48] sm:$0xff]  ;;  %v106_v19 = vld [vmem:[%s341_s5 + $0x40] sm:$0xff]  ;;  %v31_v20 = vld [vmem:[%s338_s2 + $0x18] sm:$0xff] }
   0xe   :  { %80 = vmatpush.msra.mxu1 %v35_v12  ;;  %v105_v21 = vld [vmem:[%s341_s5 + $0x38] sm:$0xff]  ;;  %v30_v22 = vld [vmem:[%s338_s2 + $0x10] sm:$0xff]  ;;  %v29_v24 = vld [vmem:[%s338_s2 + $0x8] sm:$0xff] }
   0xf   :  { %123 = vmatpush.msra.mxu2 %v108_v15  ;;  %v104_v23 = vld [vmem:[%s341_s5 + $0x30] sm:$0xff]  ;;  %v103_v25 = vld [vmem:[%s341_s5 + $0x28] sm:$0xff]  ;;  %v28_v26 = vld [vmem:[%s338_s2] sm:$0xff] }
  0x10   :  { %81 = vmatpush.msra.mxu1 %v34_v14  ;;  %v27_v27 = vld [vmem:[%s336_s0] sm:$0x3]  ;;  %v101_v29 = vld [vmem:[%s341_s5 + $0x18] sm:$0xff]  ;;  %v100_v30 = vld [vmem:[%s341_s5 + $0x10] sm:$0xff] }
  0x11   :  { %124 = vmatpush.msra.mxu2 %v107_v17  ;;  %v102_v28 = vld [vmem:[%s341_s5 + $0x20] sm:$0xff]  ;;  %v99_v31 = vld [vmem:[%s341_s5 + $0x8] sm:$0xff] }
  0x12   :  { %82 = vmatpush.msra.mxu1 %v33_v16  ;;  %v98_v32 = vld [vmem:[%s341_s5] sm:$0xff] }
  0x13   :  { %125 = vmatpush.msra.mxu2 %v106_v19  ;;  %v159_v34 = vld [vmem:[%s340_s4] ss:$0 sm:$0xff] }
  0x14   :  { %83 = vmatpush.msra.mxu1 %v32_v18  ;;  %v160_v39 = vld [vmem:[%s342_s6] ss:$0 sm:$0xff] }
  0x15   :  { %126 = vmatpush.msra.mxu2 %v105_v21 }
  0x16   :  { %84 = vmatpush.msra.mxu1 %v31_v20 }
  0x17   :  { %127 = vmatpush.msra.mxu2 %v104_v23 }
  0x18   :  { %85 = vmatpush.msra.mxu1 %v30_v22 }
  0x19   :  { %128 = vmatpush.msra.mxu2 %v103_v25 }
  0x1a   :  { %86 = vmatpush.msra.mxu1 %v29_v24 }
  0x1b   :  { %129 = vmatpush.msra.mxu2 %v102_v28 }
  0x1c   :  { %87 = vmatpush.msra.mxu1 %v28_v26 }
  0x1d   :  { %157 = vmatmul.msk.f32.vlgmr.msra.gmra.mxu1 %vm68_vm1, %v27_v27  ;;  %130 = vmatpush.msra.mxu2 %v101_v29 }
  0x1f   :  { %131 = vmatpush.msra.mxu2 %v100_v30 }
  0x21   :  { %132 = vmatpush.msra.mxu2 %v99_v31 }
  0x23   :  { %133 = vmatpush.msra.mxu2 %v98_v32 }
  0x81   :  { %v65_v33 = vpop.f32.mrf.mxu0 }
  0x9a   :  { %v89_v35 = vpop.f32.mrf.mxu1 }
  0x9b   :  { %v90_v36 = vadd.f32 %v89_v35, %v65_v33 }
  0x9d   :  { %v96_v37 = vadd.f32 %v159_v34, %v90_v36 }
  0x9f   :  { %v97_v38 = vmax.f32 %v96_v37, 0.0 }
  0xa1   :  { %134 = vmatmul.f32.vlgmr.msra.gmra.mxu2 %v97_v38 }
 0x124   :  { %v135_v40 = vpop.f32.mrf.mxu2 }
 0x125   :  { %v136_v41 = vadd.f32 %v160_v39, %v135_v40 }
 0x127   :  { %139 = vst.msk [vmem:[#allocation2] sm:$0x3] %vm138_vm2, %v136_v41 }
 0x128   :  { %150 = dma.vmem_to_hbm [thread:$0]  %s146_s19, 32, %s148_s20, [#allocation3]  }
 0x129   :  { %185 = dma.done.wait [#allocation3], 32  }
 0x12a   :  { %186 = vsyncadd [#allocation3], 4294967264 }
 0x12b   :  { %155 = vsyncpa [#allocation3], 1 }

</bundles_post_ra>
